<compile_context>
chip_gen: v5e
topology: v5e:2x2
jax: 0.10.0
libtpu: 0.0.40
codegen_flags: <defaults>
</compile_context>

<pallas_src>
import jax
import jax.numpy as jnp
from jax.experimental import pallas as pl
from jax.experimental.pallas import tpu as pltpu


def _round_up(n, m):
    return ((n + m - 1) // m) * m


# ------------- fixed per-attribute continuous weighting (plain JAX) -----------
# Lane-sparse (C = 4 or 13 << 128) and tiny: not worth a Pallas launch.
def scale_continuous(x, weight):
    return x * weight.astype(x.dtype)


# ------------- kernel: fused view(B, N, -1) + attribute Linear ----------------
def _attr_linear_kernel(x_ref, w_ref, b_ref, o_ref):
    # One MXU matmul per row tile: (TM, A*H) @ (A*H, H), explicit f32 accumulation.
    acc = jnp.dot(x_ref[...], w_ref[...], preferred_element_type=jnp.float32)
    o_ref[...] = acc + b_ref[...]


def attribute_linear(emb, w, b, *, block_rows=1024, compute_dtype=jnp.bfloat16):
    """emb: (B, N, A, H); w: (A*H, H) = torch Linear weight pre-transposed; b: (H,).

    Returns (B, N, H) float32. Memory-bound streaming matmul: the flattened
    (B*N, A*H) activation is tiled along the grid row axis, weight/bias stay
    VMEM-resident (index_map -> (0, 0)). Inputs are cast to bf16 to halve the
    dominant HBM read; accumulation / bias / output stay f32.
    """
    B, N, A, H = emb.shape
    K = A * H
    rows = B * N
    assert w.shape == (K, H), "w must be the torch weight transposed to (A*H, H)"
    assert b.shape == (H,)

    x = emb.reshape(rows, K).astype(compute_dtype)       # == torch .view(B, N, -1)
    wc = w.astype(compute_dtype)
    b2 = b.reshape(1, H).astype(jnp.float32)

    # 8-aligned row tile, capped at block_rows (mem-bound sweet spot 512-2048).
    # No wrapper-side pad/slice: grid = cdiv(rows, tm); Pallas handles the ragged
    # tail block (OOB output rows are never written back).
    tm = min(block_rows, _round_up(rows, 8))
    # Give the "parallel" axis >= 2 steps when rows allow (v7x has 2 TensorCores;
    # a 1-step grid would serialize on one core).
    if rows >= 16 and pl.cdiv(rows, tm) < 2:
        tm = _round_up(pl.cdiv(rows, 2), 8)
    grid = pl.cdiv(rows, tm)

    out = pl.pallas_call(
        _attr_linear_kernel,
        out_shape=jax.ShapeDtypeStruct((rows, H), jnp.float32),
        grid_spec=pltpu.PrefetchScalarGridSpec(
            num_scalar_prefetch=0,
            grid=(grid,),
            in_specs=[pl.BlockSpec((tm, K), lambda i: (i, 0)),   # streamed activations
                      pl.BlockSpec((K, H), lambda i: (0, 0)),    # resident weight
                      pl.BlockSpec((1, H), lambda i: (0, 0))],   # resident bias
            out_specs=pl.BlockSpec((tm, H), lambda i: (i, 0))),
        # No vmem_limit_bytes override: per-tile footprint is a few MiB, well
        # inside the default scoped limit on v5e/v6e/v7x alike.
        compiler_params=pltpu.CompilerParams(
            dimension_semantics=("parallel",)),
    )(x, wc, b2)
    # NOTE: H=32 < 128 means masked output stores / partial MXU columns; this is
    # slack while the kernel is HBM-bound, revisit if HIDDEN grows or more work
    # is fused per row.
    return out.reshape(B, N, H)


# --------------------------------- forward ------------------------------------
def input_forward(obs, embeddings, params):
    """Pallas forward for Input.

    obs        : {'Tile': {'Continuous': (B,Nt,4)},
                  'Entity': {'Continuous': (B,Ne,13), 'N': (B,1)}}
    embeddings : {'Tile': (B,Nt,At,H), 'Entity': (B,Ne,Ae,H)} — outputs of the
                 config-provided embedding modules.
    params     : {'tileWeight', 'entWeight', 'Tile': {'w','b'}, 'Entity': {'w','b'}}
    """
    # 1. fixed per-attribute scaling (feeds the external embedding modules in torch)
    scaled = {
        'Tile': scale_continuous(obs['Tile']['Continuous'], params['tileWeight']),
        'Entity': scale_continuous(obs['Entity']['Continuous'], params['entWeight']),
    }
    # TODO(synk): self.embeddings[name](entities) (config-supplied mixed
    # continuous/discrete attribute embedding modules) is external to this spec;
    # their (B, N, A, HIDDEN) outputs are taken as inputs instead of computed here.
    entity_lookup = {'N': obs['Entity']['N']}
    for name in ('Tile', 'Entity'):
        entity_lookup[name] = attribute_linear(
            embeddings[name], params[name]['w'], params[name]['b'])
    return entity_lookup, scaled


if __name__ == "__main__":
    key = jax.random.PRNGKey(0)
    B, H = 2, 32                      # batch, config.HIDDEN
    Nt, Ne = 16, 8                    # tile / entity counts
    Ct, Ce = 4, 13                    # continuous attrs (match tileWeight/entWeight)
    At, Ae = Ct + 1, Ce + 2           # total attrs per entity (continuous + discrete)

    tileWeight = jnp.array([1.0, 0.0, 0.02, 0.02], jnp.float32)
    entWeight = jnp.array([1.0, 0.0, 0.0, 0.05, 0.0, 0.02, 0.02,
                           0.1, 0.01, 0.1, 0.1, 0.1, 0.3], jnp.float32)

    ks = jax.random.split(key, 8)
    tile_cont = jax.random.normal(ks[0], (B, Nt, Ct), jnp.float32)
    ent_cont = jax.random.normal(ks[1], (B, Ne, Ce), jnp.float32)
    ent_N = jnp.array([[Ne], [Ne - 3]], dtype=jnp.int32)

    # Stand-ins for the external embedding modules' outputs.
    tile_emb = jax.random.normal(ks[2], (B, Nt, At, H), jnp.float32)
    ent_emb = jax.random.normal(ks[3], (B, Ne, Ae, H), jnp.float32)

    # Attribute Linear params (torch default init), stored pre-transposed as (in, out).
    bt_bound = 1.0 / ((At * H) ** 0.5)
    be_bound = 1.0 / ((Ae * H) ** 0.5)
    wt = jax.random.uniform(ks[4], (At * H, H), jnp.float32, -bt_bound, bt_bound)
    bt = jax.random.uniform(ks[5], (H,), jnp.float32, -bt_bound, bt_bound)
    we = jax.random.uniform(ks[6], (Ae * H, H), jnp.float32, -be_bound, be_bound)
    be = jax.random.uniform(ks[7], (H,), jnp.float32, -be_bound, be_bound)

    obs = {'Tile': {'Continuous': tile_cont},
           'Entity': {'Continuous': ent_cont, 'N': ent_N}}
    embeddings = {'Tile': tile_emb, 'Entity': ent_emb}
    params = {'tileWeight': tileWeight, 'entWeight': entWeight,
              'Tile': {'w': wt, 'b': bt}, 'Entity': {'w': we, 'b': be}}

    lookup, scaled = input_forward(obs, embeddings, params)
    lookup = jax.block_until_ready(lookup)
    scaled = jax.block_until_ready(scaled)

    # ----------------------------- pure-JAX reference -----------------------------
    bf = lambda a: a.astype(jnp.bfloat16).astype(jnp.float32)
    ref_tile_scaled = tile_cont * tileWeight
    ref_ent_scaled = ent_cont * entWeight
    ref_tile_out = bf(tile_emb).reshape(B, Nt, At * H) @ bf(wt) + bt   # bf16 operands, f32 acc
    ref_ent_out = bf(ent_emb).reshape(B, Ne, Ae * H) @ bf(we) + be
    ref_tile_f32 = tile_emb.reshape(B, Nt, At * H) @ wt + bt
    ref_ent_f32 = ent_emb.reshape(B, Ne, Ae * H) @ we + be

    assert lookup['Tile'].shape == (B, Nt, H)
    assert lookup['Entity'].shape == (B, Ne, H)
    assert jnp.array_equal(lookup['N'], ent_N)
    assert jnp.allclose(scaled['Tile'], ref_tile_scaled, atol=1e-6, rtol=1e-6)
    assert jnp.allclose(scaled['Entity'], ref_ent_scaled, atol=1e-6, rtol=1e-6)
    assert jnp.allclose(lookup['Tile'], ref_tile_out, atol=1e-3, rtol=1e-3)
    assert jnp.allclose(lookup['Entity'], ref_ent_out, atol=1e-3, rtol=1e-3)
    # bf16 activation/weight cast vs. full-f32 torch reference: loose sanity bound
    assert jnp.allclose(lookup['Tile'], ref_tile_f32, atol=5e-2, rtol=5e-2)
    assert jnp.allclose(lookup['Entity'], ref_ent_f32, atol=5e-2, rtol=5e-2)

    print("KERNEL_OK")
</pallas_src>

<mosaic_0001>
module attributes {stable_mosaic.version = 11 : i64} {
  func.func @_attr_linear_kernel(%arg0: i32, %arg1: memref<16x160xbf16, #tpu.memory_space<vmem>>, %arg2: memref<160x32xbf16, #tpu.memory_space<vmem>>, %arg3: memref<1x32xf32, #tpu.memory_space<vmem>>, %arg4: memref<16x32xf32, #tpu.memory_space<vmem>>) attributes {dimension_semantics = [#tpu.dimension_semantics<parallel>], iteration_bounds = array<i64: 2>, scalar_prefetch = 0 : i64, scratch_operands = 0 : i64, tpu.core_type = #tpu.core_type<tc>, window_params = [{transform_indices = @transform_0, window_bounds = array<i64: 16, 160>}, {pipeline_mode = #tpu.pipeline_mode<synchronous>, transform_indices = @transform_1, window_bounds = array<i64: 160, 32>}, {pipeline_mode = #tpu.pipeline_mode<synchronous>, transform_indices = @transform_2, window_bounds = array<i64: 1, 32>}, {transform_indices = @transform_3, window_bounds = array<i64: 16, 32>}]} {
    %c0 = arith.constant 0 : index
    %c0_0 = arith.constant 0 : index
    %0 = vector.load %arg1[%c0, %c0_0] : memref<16x160xbf16, #tpu.memory_space<vmem>>, vector<16x160xbf16>
    %c0_1 = arith.constant 0 : index
    %c0_2 = arith.constant 0 : index
    %1 = vector.load %arg2[%c0_1, %c0_2] : memref<160x32xbf16, #tpu.memory_space<vmem>>, vector<160x32xbf16>
    %cst = arith.constant dense<0.000000e+00> : vector<16x32xf32>
    %2 = tpu.matmul %0, %1, %cst {dimension_numbers = #tpu.dot_dimension_numbers<[1], [0], [0], [1], [0, 0, 1, 1], [], []>} : vector<16x160xbf16>, vector<160x32xbf16>, vector<16x32xf32> -> vector<16x32xf32>
    %c0_3 = arith.constant 0 : index
    %c0_4 = arith.constant 0 : index
    %3 = vector.load %arg3[%c0_3, %c0_4] : memref<1x32xf32, #tpu.memory_space<vmem>>, vector<1x32xf32>
    %4 = vector.broadcast %3 : vector<1x32xf32> to vector<16x32xf32>
    %5 = arith.addf %2, %4 : vector<16x32xf32>
    %c0_5 = arith.constant 0 : index
    %c0_6 = arith.constant 0 : index
    %6 = vector.load %arg4[%c0_5, %c0_6] : memref<16x32xf32, #tpu.memory_space<vmem>>, vector<16x32xf32>
    tpu.vector_store %arg4[%c0_5, %c0_6], %5 {strides = array<i32>} : memref<16x32xf32, #tpu.memory_space<vmem>>, vector<16x32xf32>,
    return
  }
  func.func @transform_0(%arg0: i32) -> (i32, i32) {
    %c0_i32 = arith.constant 0 : i32
    %c0_i32_0 = arith.constant 0 : i32
    return %arg0, %c0_i32 : i32, i32
  }
  func.func @transform_1(%arg0: i32) -> (i32, i32) {
    %c0_i32 = arith.constant 0 : i32
    %c0_i32_0 = arith.constant 0 : i32
    %c0_i32_1 = arith.constant 0 : i32
    return %c0_i32, %c0_i32_0 : i32, i32
  }
  func.func @transform_2(%arg0: i32) -> (i32, i32) {
    %c0_i32 = arith.constant 0 : i32
    %c0_i32_0 = arith.constant 0 : i32
    %c0_i32_1 = arith.constant 0 : i32
    return %c0_i32, %c0_i32_0 : i32, i32
  }
  func.func @transform_3(%arg0: i32) -> (i32, i32) {
    %c0_i32 = arith.constant 0 : i32
    %c0_i32_0 = arith.constant 0 : i32
    return %arg0, %c0_i32 : i32, i32
  }
}

</mosaic_0001>

<bundles_post_ra>
// kernel: tpu_custom_call.1
= control target key start
LH: loop header
LB: loop body
LE: loop exit
PB: predicated region body
PF: predicated region fallthrough
CT: control target
= control target key end

     0   :  { %8 = vsyncpa [#allocation3], 0  ;;  %s707_s0 = inlined_call_operand.vmem [shape: bf16[32,160], index: 0, kind: input, shape index: {}]   ;;  %s708_s1 = inlined_call_operand.vmem [shape: bf16[160,32], index: 1, kind: input, shape index: {}]   ;;  %s709_s2 = inlined_call_operand.vmem [shape: f32[1,32], index: 2, kind: input, shape index: {}]   ;;  %s710_s3 = inlined_call_operand.hbm [shape: f32[32,32], index: 3, kind: output, shape index: {}]  }
   0x1   :  { %10 = vsyncpa [#allocation3 + $0x1], 0  ;;  %s587_s12 = smov 0   ;;  %s589_s13 = smov 0  }
   0x2   :  { %s591_s14 = smov 0   ;;  %s593_s15 = smov 0  }
   0x3 LB: > { %s608_s16 = sadd.s32 4294967295, %s563_s15   ;;  %s383_s17 = sadd.s32 4294967294, %s563_s15   ;;  %s563_s15 = sphi %s593_s15, %s716_s15   ;;  %s559_s14 = sphi %s591_s14, %s715_s14   ;;  %s555_s13 = sphi %s589_s13, %s714_s13   ;;  %s551_s12 = sphi %s587_s12, %s713_s12  }
   0x4   : > { %s612_s18 = sadd.s32 1, %s563_s15   ;;  %s91_s19 = sadd.s32 1, %s559_s14 }
   0x5   : > { %s88_s20 = ssub.s32 %s563_s15, %s612_s18  ;;  %p101_p0 = scmp.ne.s32.totalorder %s559_s14, %s555_s13 }
   0x6   : > { %p89_p1 = scmp.eq.s32.totalorder %s88_s20, 0  ;;  %p102_p2 = scmp.eq.s32.totalorder %s608_s16, 1 }
   0x7   : > { %p107_p3 = scmp.ne.s32.totalorder %s555_s13, %s551_s12  ;;  %p108_p4 = scmp.eq.s32.totalorder %s383_s17, 1 }
   0x8   : > { %s623_s21 = scalar_select %p89_p1, %s559_s14, %s91_s19  }
   0x9   : > { %p625_p5 = por %p102_p2, %p101_p0  ;;  %p629_p6 = por %p108_p4, %p107_p3 }
   0xa   : > { %p386_p7 = scmp.ge.s32.totalorder %s563_s15, 1  ;;  %p142_p8 = scmp.lt.s32.totalorder %s563_s15, 3 }
   0xc   : > { %p143_p9 = pnand %p386_p7, %p142_p8 }
   0xd   : > { %s388_s26 = sshll.u32 (!%p143_p9), %s608_s16, 1  ;;  %s164_s4 = sand.u32 (!%p143_p9), 1, %s555_s13  }
   0xe   : > { %146 = sbr.rel (%p143_p9) target bundleno = 193 (0xc1), region = 32  ;;  %p168_p10 = scmp.lt.s32.totalorder (!%p143_p9), %s388_s26, 3 }
   0xf   : > { %s387_s7 = sshll.u32 (!%p143_p9), %s164_s4, 4  ;;  %s458_s8 = sshll.u32 (!%p143_p9), %s608_s16, 4 }
  0x10   : > { %s317_s17 = scalar_lea.hbm (!%p143_p9), %s710_s3, %s458_s8  ;;  %s166_s19 = scalar_lea.vmem (!%p143_p9), [#allocation2], %s387_s7 }
  0x11   : > { %s320_s20 = sshll.u32 (!%p143_p9), %s317_s17, 4  ;;  %s306_s16 = scalar_lea.sflag (!%p143_p9), [#allocation3], %s164_s4  ;;  %s321_s20 = int_to_ptr.hbm [resolvable:$true] %s320_s20 }
  0x12   : > { %s515_s24 = sshra.s32 (!%p143_p9), %s321_s20, 4  ;;  %s521_s28 = scalar_lea.hbm (!%p143_p9), %s710_s3, 32  ;;  %s516_s24 = int_to_ptr.hbm [resolvable:$true] %s515_s24 }
  0x13   : > { %v455_v0 = vld [vmem:[%s708_s1 + $0x38] sm:$0xff]  ;;  %v457_v1 = vld [vmem:[%s708_s1 + $0x48] sm:$0xff]  ;;  %v454_v2 = vld [vmem:[%s708_s1 + $0x30] sm:$0xff]  ;;  %s718_s26 = smov (!%p168_p10, %s388_s26), 3  ;;  %vm271_vm0 = vcmask 261120   ;;  %s517_s25 = scalar_lea.hbm %s516_s24, 16 }
  0x14   : > { %275 = vmatpush.bf16.msra.mxu0 %v455_v0  ;;  %295 = vmatpush.bf16.msra.mxu1 %v457_v1  ;;  %v456_v3 = vld [vmem:[%s708_s1 + $0x40] sm:$0xff]  ;;  %s445_s6 = sshll.u32 %s718_s26, 3  ;;  %v453_v4 = vld [vmem:[%s708_s1 + $0x28] sm:$0xff]  ;;  %v451_v9 = vld [vmem:[%s708_s1 + $0x18] sm:$0xff]  ;;  %p518_p11 = scmp.ne.s32.totalorder %s516_s24, %s517_s25 }
  0x15   : > { %s172_s11 = scalar_lea.vmem %s707_s0, %s445_s6  ;;  %v452_v8 = vld [vmem:[%s708_s1 + $0x20] sm:$0xff]  ;;  %v450_v10 = vld [vmem:[%s708_s1 + $0x10] sm:$0xff]  ;;  %v449_v11 = vld [vmem:[%s708_s1 + $0x8] sm:$0xff]  ;;  %p522_p0 = scmp.lt.s32.totalorder %s516_s24, %s710_s3 }
  0x16   : > { %v446_v5 = vld [vmem:[%s172_s11 + $0x4] sm:$0xf]  ;;  %v395_v6 = vld [vmem:[%s172_s11 + $0x8] sm:$0xf0]  ;;  %v393_v13 = vld [vmem:[%s172_s11] sm:$0xf]  ;;  %p519_p12 = pnand %p518_p11, %p625_p5  ;;  %p523_p1 = scmp.lt.s32.totalorder %s521_s28, %s517_s25 }
  0x17   : > { %v398_v7 = vor.u32 %v446_v5, %v395_v6  ;;  %v448_v12 = vld [vmem:[%s708_s1] sm:$0xff]  ;;  %v447_v14 = vld [vmem:[%s172_s11 + $0x4] sm:$0xf0]  ;;  %s318_s11 = sshll.u32 %s166_s19, 4  ;;  %s319_s11 = int_to_ptr.vmem [resolvable:$true] %s318_s11 }
  0x18   : > { %276 = vmatpush.bf16.msra.mxu0 %v454_v2  ;;  %296 = vmatpush.bf16.msra.mxu1 %v456_v3  ;;  %v394_v15 = vor.u32 %v447_v14, %v393_v13  ;;  %v500_v16 = vld [vmem:[%s709_s2] ss:$0 sm:$0xff]  ;;  %p520_p13 = pneg %p519_p12  ;;  %p524_p2 = por %p523_p1, %p522_p0 }
  0x1a   : > { %p525_p3 = pnand %p524_p2, %p520_p13 }
  0x1b   : > { %439 = vmatmul.msk.bf16.vlgmr.msra.gmra.mxu1 %vm271_vm0, %v398_v7 }
  0x1c   : > { %277 = vmatpush.bf16.msra.mxu0 %v453_v4 }
  0x20   : > { %278 = vmatpush.bf16.msra.mxu0 %v452_v8 }
  0x24   : > { %279 = vmatpush.bf16.msra.mxu0 %v451_v9 }
  0x28   : > { %280 = vmatpush.bf16.msra.mxu0 %v450_v10 }
  0x2c   : > { %281 = vmatpush.bf16.msra.mxu0 %v449_v11 }
  0x30   : > { %282 = vmatpush.bf16.msra.mxu0 %v448_v12 }
  0x33   : > { %283 = vmatmul.bf16.vlgmr.msra.gmra.mxu0 %v394_v15 }
  0x98   : > { %v298_v17 = vpop.f32.mrf.mxu1 }
  0xa0   : > { %v300_v23 = vpop.f32.mrf.mxu1 }
  0xb0   : > { %v284_v18 = vpop.f32.mrf.mxu0 }
  0xb1   : > { %v285_v19 = vadd.f32 %v500_v16, %v284_v18 }
  0xb3   : > { %v299_v20 = vadd.f32 %v298_v17, %v285_v19 }
  0xb5   : > { %303 = vst.msk [vmem:[%s166_s19] sm:$0xff] %vm271_vm0, %v299_v20 }
  0xb8   : > { %v286_v21 = vpop.f32.mrf.mxu0 }
  0xb9   : > { %v287_v22 = vadd.f32 %v500_v16, %v286_v21 }
  0xbb   : > { %v301_v24 = vadd.f32 %v300_v23, %v287_v22 }
  0xbd   : > { %304 = vst.msk [vmem:[%s166_s19 + $0x8] sm:$0xff] %vm271_vm0, %v301_v24 }
  0xbe   : > { %528 = shalt.err (!%p525_p3)
}
  0xbf   : > { %s565_s4 = smov 128   ;;  %s566_s5 = smov 8  }
  0xc0   : > { %459 = dma.vmem_to_hbm [thread:$0]  (%p625_p5), %s319_s11, 256, %s321_s20, %s306_s16, %s565_s4, %s565_s4, %s566_s5  }
  0xc1 PF: > { %p465_p4 = scmp.ge.s32.totalorder %s563_s15, 2  ;;  %s335_s6 = sand.u32 1, %s551_s12  }
  0xc2   : > { %s336_s7 = scalar_lea.sflag [#allocation3], %s335_s6 }
  0xc3   : > { %p462_p7 = pnand %p465_p4, %p629_p6 }
  0xc5   : > { %p463_p8 = pneg %p462_p7 }
  0xc7   : > { %546 = dma.done.wait (%p463_p8), %s336_s7, 256  }
  0xc8   : > { %548 = vsyncadd (%p463_p8), %s336_s7, 4294967040  ;;  %p13_p9 = scmp.ge.s32.totalorder %s612_s18, 4   ;;  %s713_s12 = smov %s555_s13 }
  0xc9   : > { %s714_s13 = smov %s559_s14  ;;  %s715_s14 = smov %s623_s21 }
  0xca   : > { %s716_s15 = smov %s612_s18  ;;  %15 = sbr.rel (!%p13_p9) target bundleno = 3 (0x3), region = 67 }
  0xcf   :  { %342 = vsyncpa [#allocation3], 1 }
  0xd0   :  { %344 = vsyncpa [#allocation3 + $0x1], 1 }

</bundles_post_ra>
